<compile_context>
chip_gen: v7x
topology: tpu7x:2x2x1
jax: 0.10.0
libtpu: 0.0.40
codegen_flags: <defaults>
</compile_context>

<pallas_src>
import jax
import jax.numpy as jnp
from jax import lax
from jax.experimental import pallas as pl
from jax.experimental.pallas import tpu as pltpu

OUT_W = 8                    # narrow lane-dense output slab (4 useful lanes)
TILE_B_MAX = 2048            # max batch rows per grid step (few MiB of VMEM)
MIN_ROWS_FOR_TWO_STEPS = 64  # force >=2 grid steps above this (v7x megacore)


def _dqn_kernel(x_ref,
                w1_ref, b1_ref,      # features: Linear(state_size -> H)
                w2_ref, b2_ref,      # features: Linear(H -> H)
                wh1_ref, bh1_ref,    # fused head layer 1: Linear(H -> 64) = ws1||wq1
                wh2_ref, bh2_ref,    # fused head layer 2: block-diag [64, OUT_W]
                out_ref):
    cdt = w1_ref.dtype  # MXU input dtype (bf16 or f32); accumulation is always f32.

    # In-kernel cast of the f32 activation tile to the compute dtype (free VPU work).
    x = x_ref[...].astype(cdt)

    # features = ReLU(ReLU(x @ W1 + b1) @ W2 + b2)  (f32 accumulate / f32 activations)
    h = jnp.dot(x, w1_ref[...], preferred_element_type=jnp.float32) + b1_ref[...]
    h = jnp.maximum(h, 0.0)
    h = jnp.dot(h.astype(cdt), w2_ref[...], preferred_element_type=jnp.float32) + b2_ref[...]
    h = jnp.maximum(h, 0.0)

    # fused heads: one [H, 64] matmul + ReLU, then one block-diagonal [64, OUT_W]
    # matmul producing steering in lane 0 and the 3 speed Q-values in lanes 1:4.
    hh = jnp.dot(h.astype(cdt), wh1_ref[...], preferred_element_type=jnp.float32) + bh1_ref[...]
    hh = jnp.maximum(hh, 0.0)
    out = jnp.dot(hh.astype(cdt), wh2_ref[...], preferred_element_type=jnp.float32) + bh2_ref[...]

    # Tanh only on lane 0 (steering); the slab is only OUT_W=8 lanes wide now,
    # so the discarded EUP work is negligible.
    lane = lax.broadcasted_iota(jnp.int32, out.shape, 1)
    out = jnp.where(lane == 0, jnp.tanh(out), out)

    out_ref[...] = out.astype(out_ref.dtype)


def prepare_params(params, compute_dtype=jnp.bfloat16):
    """Fuses the per-layer parameters into the kernel's layout.

    compute_dtype controls the MXU input dtype (bf16 default, f32 for
    bit-exactness); biases stay f32 so accumulation and activations remain f32.
    """
    w1 = params["w1"]
    state_size, hidden = w1.shape

    # Fuse the two head first layers: [H,32] || [H,32] -> [H,64].
    wh1 = jnp.concatenate([params["ws1"], params["wq1"]], axis=1)
    bh1 = jnp.concatenate([params["bs1"], params["bq1"]], axis=1)

    # Block-diagonal fused second head layer, narrow lane-dense to OUT_W:
    #   column 0    <- steering  (rows 0:32  = ws2)
    #   columns 1:4 <- speed_q   (rows 32:64 = wq2)
    wh2 = jnp.zeros((64, OUT_W), jnp.float32)
    wh2 = wh2.at[0:32, 0:1].set(params["ws2"])
    wh2 = wh2.at[32:64, 1:4].set(params["wq2"])
    bh2 = jnp.zeros((1, OUT_W), jnp.float32)
    bh2 = bh2.at[:, 0:1].set(params["bs2"])
    bh2 = bh2.at[:, 1:4].set(params["bq2"])

    return dict(
        w1=w1.astype(compute_dtype), b1=params["b1"],
        w2=params["w2"].astype(compute_dtype), b2=params["b2"],
        wh1=wh1.astype(compute_dtype), bh1=bh1,
        wh2=wh2.astype(compute_dtype), bh2=bh2,
        state_size=state_size,
    )


def continuous_dqn_forward(x, fp):
    """Runs the ContinuousDQN forward pass in a single batch-tiled Pallas kernel.

    Args:
      x:  [batch, state_size] float32 (kept f32 in HBM; cast happens in-kernel).
      fp: fused params from prepare_params().
    Returns:
      (steering [batch, 1], speed_q [batch, 3]) float32.
    """
    batch, state_size = x.shape
    assert state_size == fp["state_size"]

    # Tile selection: minimal padding, >=2 grid steps for v7x once there is
    # enough work (each step writes its own output block -> safe "parallel").
    b8 = pl.cdiv(batch, 8) * 8
    n_steps = max(pl.cdiv(b8, TILE_B_MAX),
                  2 if b8 >= MIN_ROWS_FOR_TWO_STEPS else 1)
    tile_b = pl.cdiv(pl.cdiv(b8, n_steps), 8) * 8
    b_pad = tile_b * n_steps

    # Pad only the few trailing rows needed (skip entirely when aligned);
    # padded rows are garbage-in/garbage-out and sliced off below.
    xp = x if b_pad == batch else jnp.pad(x, ((0, b_pad - batch), (0, 0)))

    def resident(shape):  # weights/biases: same block every step -> VMEM-resident
        return pl.BlockSpec(shape, lambda i: (0, 0))

    out_slab = pl.pallas_call(
        _dqn_kernel,
        out_shape=jax.ShapeDtypeStruct((b_pad, OUT_W), jnp.float32),
        grid=(n_steps,),
        in_specs=[
            # full last dim (state_size) -> exempt from the 128-lane rule
            pl.BlockSpec((tile_b, state_size), lambda i: (i, 0)),
            resident(fp["w1"].shape), resident(fp["b1"].shape),
            resident(fp["w2"].shape), resident(fp["b2"].shape),
            resident(fp["wh1"].shape), resident(fp["bh1"].shape),
            resident(fp["wh2"].shape), resident(fp["bh2"].shape),
        ],
        out_specs=pl.BlockSpec((tile_b, OUT_W), lambda i: (i, 0)),
        compiler_params=pltpu.CompilerParams(
            dimension_semantics=("parallel",)),
    )(xp, fp["w1"], fp["b1"], fp["w2"], fp["b2"],
      fp["wh1"], fp["bh1"], fp["wh2"], fp["bh2"])

    steering = out_slab[:batch, 0:1]
    speed_q = out_slab[:batch, 1:4]
    return steering, speed_q


def init_params(key, state_size=35, hidden_size=128):
    """Deterministic PyTorch-style (uniform +-1/sqrt(fan_in)) init.

    Weights are stored as [in_features, out_features] so the kernel does x @ W.
    """
    def linear(key, fan_in, fan_out):
        kw, kb = jax.random.split(key)
        bound = 1.0 / jnp.sqrt(jnp.float32(fan_in))
        w = jax.random.uniform(kw, (fan_in, fan_out), jnp.float32, -bound, bound)
        b = jax.random.uniform(kb, (1, fan_out), jnp.float32, -bound, bound)
        return w, b

    keys = jax.random.split(key, 6)
    w1, b1 = linear(keys[0], state_size, hidden_size)
    w2, b2 = linear(keys[1], hidden_size, hidden_size)
    ws1, bs1 = linear(keys[2], hidden_size, 32)
    ws2, bs2 = linear(keys[3], 32, 1)
    wq1, bq1 = linear(keys[4], hidden_size, 32)
    wq2, bq2 = linear(keys[5], 32, 3)
    return dict(
        w1=w1, b1=b1, w2=w2, b2=b2,
        ws1=ws1, bs1=bs1, ws2=ws2, bs2=bs2,
        wq1=wq1, bq1=bq1, wq2=wq2, bq2=bq2,
    )


def _reference_forward(x, p):
    """Pure-JAX reference matching the PyTorch module semantics."""
    h = jnp.maximum(x @ p["w1"] + p["b1"], 0.0)
    h = jnp.maximum(h @ p["w2"] + p["b2"], 0.0)
    s = jnp.maximum(h @ p["ws1"] + p["bs1"], 0.0)
    steering = jnp.tanh(s @ p["ws2"] + p["bs2"])
    q = jnp.maximum(h @ p["wq1"] + p["bq1"], 0.0)
    speed_q = q @ p["wq2"] + p["bq2"]
    return steering, speed_q


if __name__ == "__main__":
    key = jax.random.PRNGKey(0)
    k_params, k_x, k_x2 = jax.random.split(key, 3)

    STATE_SIZE = 35
    HIDDEN = 128
    BATCH = 8

    params = init_params(k_params, state_size=STATE_SIZE, hidden_size=HIDDEN)
    x = jax.random.normal(k_x, (BATCH, STATE_SIZE), dtype=jnp.float32)
    ref_steering, ref_speed = _reference_forward(x, params)

    # f32 MXU path (bit-accuracy check against the PyTorch-style reference).
    fused_f32 = prepare_params(params, compute_dtype=jnp.float32)
    steering, speed_q = continuous_dqn_forward(x, fused_f32)
    jax.block_until_ready((steering, speed_q))
    assert steering.shape == (BATCH, 1) and speed_q.shape == (BATCH, 3)
    assert jnp.allclose(steering, ref_steering, atol=1e-5, rtol=1e-5)
    assert jnp.allclose(speed_q, ref_speed, atol=1e-5, rtol=1e-5)

    # Default bf16-matmul / f32-accumulate path (faster MXU, half the weight DMA).
    fused_bf16 = prepare_params(params)
    steering_b, speed_b = continuous_dqn_forward(x, fused_bf16)
    jax.block_until_ready((steering_b, speed_b))
    assert jnp.allclose(steering_b, ref_steering, atol=1e-1, rtol=1e-1)
    assert jnp.allclose(speed_b, ref_speed, atol=1e-1, rtol=1e-1)

    # Awkward batch size: exercises the multi-step grid + minimal ragged pad.
    BATCH2 = 101
    x2 = jax.random.normal(k_x2, (BATCH2, STATE_SIZE), dtype=jnp.float32)
    ref_s2, ref_q2 = _reference_forward(x2, params)
    s2, q2 = continuous_dqn_forward(x2, fused_f32)
    jax.block_until_ready((s2, q2))
    assert s2.shape == (BATCH2, 1) and q2.shape == (BATCH2, 3)
    assert jnp.allclose(s2, ref_s2, atol=1e-5, rtol=1e-5)
    assert jnp.allclose(q2, ref_q2, atol=1e-5, rtol=1e-5)

    print("KERNEL_OK")
</pallas_src>

<mosaic_0001>
module attributes {stable_mosaic.version = 11 : i64} {
  func.func @_dqn_kernel(%arg0: i32, %arg1: memref<8x35xf32, #tpu.memory_space<vmem>>, %arg2: memref<35x128xf32, #tpu.memory_space<vmem>>, %arg3: memref<1x128xf32, #tpu.memory_space<vmem>>, %arg4: memref<128x128xf32, #tpu.memory_space<vmem>>, %arg5: memref<1x128xf32, #tpu.memory_space<vmem>>, %arg6: memref<128x64xf32, #tpu.memory_space<vmem>>, %arg7: memref<1x64xf32, #tpu.memory_space<vmem>>, %arg8: memref<64x8xf32, #tpu.memory_space<vmem>>, %arg9: memref<1x8xf32, #tpu.memory_space<vmem>>, %arg10: memref<8x8xf32, #tpu.memory_space<vmem>>) attributes {dimension_semantics = [#tpu.dimension_semantics<parallel>], iteration_bounds = array<i64: 1>, scalar_prefetch = 0 : i64, scratch_operands = 0 : i64, tpu.core_type = #tpu.core_type<tc>, window_params = [{transform_indices = @transform_0, window_bounds = array<i64: 8, 35>}, {pipeline_mode = #tpu.pipeline_mode<synchronous>, transform_indices = @transform_1, window_bounds = array<i64: 35, 128>}, {pipeline_mode = #tpu.pipeline_mode<synchronous>, transform_indices = @transform_2, window_bounds = array<i64: 1, 128>}, {pipeline_mode = #tpu.pipeline_mode<synchronous>, transform_indices = @transform_3, window_bounds = array<i64: 128, 128>}, {pipeline_mode = #tpu.pipeline_mode<synchronous>, transform_indices = @transform_4, window_bounds = array<i64: 1, 128>}, {pipeline_mode = #tpu.pipeline_mode<synchronous>, transform_indices = @transform_5, window_bounds = array<i64: 128, 64>}, {pipeline_mode = #tpu.pipeline_mode<synchronous>, transform_indices = @transform_6, window_bounds = array<i64: 1, 64>}, {pipeline_mode = #tpu.pipeline_mode<synchronous>, transform_indices = @transform_7, window_bounds = array<i64: 64, 8>}, {pipeline_mode = #tpu.pipeline_mode<synchronous>, transform_indices = @transform_8, window_bounds = array<i64: 1, 8>}, {transform_indices = @transform_9, window_bounds = array<i64: 8, 8>}]} {
    %c0 = arith.constant 0 : index
    %c0_0 = arith.constant 0 : index
    %0 = vector.load %arg1[%c0, %c0_0] : memref<8x35xf32, #tpu.memory_space<vmem>>, vector<8x35xf32>
    %c0_1 = arith.constant 0 : index
    %c0_2 = arith.constant 0 : index
    %1 = vector.load %arg2[%c0_1, %c0_2] : memref<35x128xf32, #tpu.memory_space<vmem>>, vector<35x128xf32>
    %cst = arith.constant dense<0.000000e+00> : vector<8x128xf32>
    %2 = tpu.matmul %0, %1, %cst {dimension_numbers = #tpu.dot_dimension_numbers<[1], [0], [0], [1], [0, 0, 1, 1], [], []>} : vector<8x35xf32>, vector<35x128xf32>, vector<8x128xf32> -> vector<8x128xf32>
    %c0_3 = arith.constant 0 : index
    %c0_4 = arith.constant 0 : index
    %3 = vector.load %arg3[%c0_3, %c0_4] : memref<1x128xf32, #tpu.memory_space<vmem>>, vector<1x128xf32>
    %4 = vector.broadcast %3 : vector<1x128xf32> to vector<8x128xf32>
    %5 = arith.addf %2, %4 : vector<8x128xf32>
    %cst_5 = arith.constant 0.000000e+00 : f32
    %6 = vector.broadcast %cst_5 : f32 to vector<8x128xf32>
    %7 = arith.maximumf %5, %6 : vector<8x128xf32>
    %c0_6 = arith.constant 0 : index
    %c0_7 = arith.constant 0 : index
    %8 = vector.load %arg4[%c0_6, %c0_7] : memref<128x128xf32, #tpu.memory_space<vmem>>, vector<128x128xf32>
    %cst_8 = arith.constant dense<0.000000e+00> : vector<8x128xf32>
    %9 = tpu.matmul %7, %8, %cst_8 {dimension_numbers = #tpu.dot_dimension_numbers<[1], [0], [0], [1], [0, 0, 1, 1], [], []>} : vector<8x128xf32>, vector<128x128xf32>, vector<8x128xf32> -> vector<8x128xf32>
    %c0_9 = arith.constant 0 : index
    %c0_10 = arith.constant 0 : index
    %10 = vector.load %arg5[%c0_9, %c0_10] : memref<1x128xf32, #tpu.memory_space<vmem>>, vector<1x128xf32>
    %11 = vector.broadcast %10 : vector<1x128xf32> to vector<8x128xf32>
    %12 = arith.addf %9, %11 : vector<8x128xf32>
    %cst_11 = arith.constant 0.000000e+00 : f32
    %13 = vector.broadcast %cst_11 : f32 to vector<8x128xf32>
    %14 = arith.maximumf %12, %13 : vector<8x128xf32>
    %c0_12 = arith.constant 0 : index
    %c0_13 = arith.constant 0 : index
    %15 = vector.load %arg6[%c0_12, %c0_13] : memref<128x64xf32, #tpu.memory_space<vmem>>, vector<128x64xf32>
    %cst_14 = arith.constant dense<0.000000e+00> : vector<8x64xf32>
    %16 = tpu.matmul %14, %15, %cst_14 {dimension_numbers = #tpu.dot_dimension_numbers<[1], [0], [0], [1], [0, 0, 1, 1], [], []>} : vector<8x128xf32>, vector<128x64xf32>, vector<8x64xf32> -> vector<8x64xf32>
    %c0_15 = arith.constant 0 : index
    %c0_16 = arith.constant 0 : index
    %17 = vector.load %arg7[%c0_15, %c0_16] : memref<1x64xf32, #tpu.memory_space<vmem>>, vector<1x64xf32>
    %18 = vector.broadcast %17 : vector<1x64xf32> to vector<8x64xf32>
    %19 = arith.addf %16, %18 : vector<8x64xf32>
    %cst_17 = arith.constant 0.000000e+00 : f32
    %20 = vector.broadcast %cst_17 : f32 to vector<8x64xf32>
    %21 = arith.maximumf %19, %20 : vector<8x64xf32>
    %c0_18 = arith.constant 0 : index
    %c0_19 = arith.constant 0 : index
    %22 = vector.load %arg8[%c0_18, %c0_19] : memref<64x8xf32, #tpu.memory_space<vmem>>, vector<64x8xf32>
    %cst_20 = arith.constant dense<0.000000e+00> : vector<8x8xf32>
    %23 = tpu.matmul %21, %22, %cst_20 {dimension_numbers = #tpu.dot_dimension_numbers<[1], [0], [0], [1], [0, 0, 1, 1], [], []>} : vector<8x64xf32>, vector<64x8xf32>, vector<8x8xf32> -> vector<8x8xf32>
    %c0_21 = arith.constant 0 : index
    %c0_22 = arith.constant 0 : index
    %24 = vector.load %arg9[%c0_21, %c0_22] : memref<1x8xf32, #tpu.memory_space<vmem>>, vector<1x8xf32>
    %25 = vector.broadcast %24 : vector<1x8xf32> to vector<8x8xf32>
    %26 = arith.addf %23, %25 : vector<8x8xf32>
    %27 = tpu.iota {dimensions = array<i32: 1>} : vector<8x8xi32>
    %c0_i32 = arith.constant 0 : i32
    %28 = vector.broadcast %c0_i32 : i32 to vector<8x8xi32>
    %29 = arith.cmpi eq, %27, %28 : vector<8x8xi32>
    %30 = math.tanh %26 : vector<8x8xf32>
    %31 = arith.select %29, %30, %26 : vector<8x8xi1>, vector<8x8xf32>
    %c0_23 = arith.constant 0 : index
    %c0_24 = arith.constant 0 : index
    %32 = vector.load %arg10[%c0_23, %c0_24] : memref<8x8xf32, #tpu.memory_space<vmem>>, vector<8x8xf32>
    tpu.vector_store %arg10[%c0_23, %c0_24], %31 {strides = array<i32>} : memref<8x8xf32, #tpu.memory_space<vmem>>, vector<8x8xf32>,
    return
  }
  func.func @transform_0(%arg0: i32) -> (i32, i32) {
    %c0_i32 = arith.constant 0 : i32
    %c0_i32_0 = arith.constant 0 : i32
    return %arg0, %c0_i32 : i32, i32
  }
  func.func @transform_1(%arg0: i32) -> (i32, i32) {
    %c0_i32 = arith.constant 0 : i32
    %c0_i32_0 = arith.constant 0 : i32
    %c0_i32_1 = arith.constant 0 : i32
    return %c0_i32, %c0_i32_0 : i32, i32
  }
  func.func @transform_2(%arg0: i32) -> (i32, i32) {
    %c0_i32 = arith.constant 0 : i32
    %c0_i32_0 = arith.constant 0 : i32
    %c0_i32_1 = arith.constant 0 : i32
    return %c0_i32, %c0_i32_0 : i32, i32
  }
  func.func @transform_3(%arg0: i32) -> (i32, i32) {
    %c0_i32 = arith.constant 0 : i32
    %c0_i32_0 = arith.constant 0 : i32
    %c0_i32_1 = arith.constant 0 : i32
    return %c0_i32, %c0_i32_0 : i32, i32
  }
  func.func @transform_4(%arg0: i32) -> (i32, i32) {
    %c0_i32 = arith.constant 0 : i32
    %c0_i32_0 = arith.constant 0 : i32
    %c0_i32_1 = arith.constant 0 : i32
    return %c0_i32, %c0_i32_0 : i32, i32
  }
  func.func @transform_5(%arg0: i32) -> (i32, i32) {
    %c0_i32 = arith.constant 0 : i32
    %c0_i32_0 = arith.constant 0 : i32
    %c0_i32_1 = arith.constant 0 : i32
    return %c0_i32, %c0_i32_0 : i32, i32
  }
  func.func @transform_6(%arg0: i32) -> (i32, i32) {
    %c0_i32 = arith.constant 0 : i32
    %c0_i32_0 = arith.constant 0 : i32
    %c0_i32_1 = arith.constant 0 : i32
    return %c0_i32, %c0_i32_0 : i32, i32
  }
  func.func @transform_7(%arg0: i32) -> (i32, i32) {
    %c0_i32 = arith.constant 0 : i32
    %c0_i32_0 = arith.constant 0 : i32
    %c0_i32_1 = arith.constant 0 : i32
    return %c0_i32, %c0_i32_0 : i32, i32
  }
  func.func @transform_8(%arg0: i32) -> (i32, i32) {
    %c0_i32 = arith.constant 0 : i32
    %c0_i32_0 = arith.constant 0 : i32
    %c0_i32_1 = arith.constant 0 : i32
    return %c0_i32, %c0_i32_0 : i32, i32
  }
  func.func @transform_9(%arg0: i32) -> (i32, i32) {
    %c0_i32 = arith.constant 0 : i32
    %c0_i32_0 = arith.constant 0 : i32
    return %arg0, %c0_i32 : i32, i32
  }
}

</mosaic_0001>

<bundles_post_ra>
// kernel: tpu_custom_call.1
= control target key start
LH: loop header
LB: loop body
LE: loop exit
PB: predicated region body
PF: predicated region fallthrough
CT: control target
= control target key end

     0   :  { %v677_v3 = vmov 0.0|0.0   ;;  %vm678_vm0 = vmmov 0   ;;  %v679_v6 = vmov 0.0   ;;  %s924_s0 = inlined_call_operand.vmem [shape: f32[8,35], index: 0, kind: input, shape index: {}]   ;;  %s925_s1 = inlined_call_operand.vmem [shape: f32[35,128], index: 1, kind: input, shape index: {}]   ;;  %s926_s2 = inlined_call_operand.vmem [shape: f32[1,128], index: 2, kind: input, shape index: {}]   ;;  %s927_s3 = inlined_call_operand.vmem [shape: f32[128,128], index: 3, kind: input, shape index: {}]   ;;  %s928_s4 = inlined_call_operand.vmem [shape: f32[1,128], index: 4, kind: input, shape index: {}]   ;;  %s929_s5 = inlined_call_operand.vmem [shape: f32[128,64], index: 5, kind: input, shape index: {}]   ;;  %s930_s6 = inlined_call_operand.vmem [shape: f32[1,64], index: 6, kind: input, shape index: {}]   ;;  %s931_s7 = inlined_call_operand.vmem [shape: f32[64,8], index: 7, kind: input, shape index: {}]   ;;  %s932_s8 = inlined_call_operand.vmem [shape: f32[1,8], index: 8, kind: input, shape index: {}]   ;;  %s933_s9 = inlined_call_operand.hbm [shape: f32[8,8], index: 9, kind: output, shape index: {}]  }
   0x1   :  { %v34_v0 = vld [vmem:[%s925_s1] sm:$0xff]  ;;  %v35_v1 = vld [vmem:[%s925_s1 + $0x8] sm:$0xff]  ;;  %v36_v2 = vld [vmem:[%s925_s1 + $0x10] sm:$0xff]  ;;  %581 = vmatprep.subr.bf16.mxu0 %v677_v3  ;;  %587 = vmatprep.subr.bf16.mxu1 %v677_v3 }
   0x2   :  { %v582_v4 = vpack.c.bf16 %v35_v1, %v34_v0  ;;  %v37_v5 = vld [vmem:[%s925_s1 + $0x18] sm:$0xff]  ;;  %489 = vmatprep.mubr.msk.f32.mxu0 %vm678_vm0, %v679_v6  ;;  %v125_v7 = vld [vmem:[%s927_s3] sm:$0xff]  ;;  %v126_v8 = vld [vmem:[%s927_s3 + $0x8] sm:$0xff]  ;;  %524 = vmatprep.mubr.msk.f32.mxu1 %vm678_vm0, %v679_v6 }
   0x3   :  { %v127_v9 = vld [vmem:[%s927_s3 + $0x10] sm:$0xff]  ;;  %v585_v10 = vpack.c.bf16 %v37_v5, %v36_v2  ;;  %v588_v11 = vpack.c.bf16 %v126_v8, %v125_v7  ;;  %v128_v12 = vld [vmem:[%s927_s3 + $0x18] sm:$0xff]  ;;  %v129_v14 = vld [vmem:[%s927_s3 + $0x20] sm:$0xff] }
   0x4   :  { %583 = vmatpush3.bf16.msra.mxu0 %v582_v4  ;;  %v591_v13 = vpack.c.bf16 %v128_v12, %v127_v9  ;;  %v130_v15 = vld [vmem:[%s927_s3 + $0x28] sm:$0xff] }
   0x5   :  { %584 = vmatprep.subr.bf16.mxu0 %v677_v3  ;;  %589 = vmatpush3.bf16.msra.mxu1 %v588_v11 }
   0x6   :  { %590 = vmatprep.subr.bf16.mxu1 %v677_v3 }
   0x8   :  { %586 = vmatpush3.bf16.msra.mxu0 %v585_v10 }
   0x9   :  { %14 = vsyncpa [#allocation3], 0  ;;  %487 = vmatprep.subr.mxu0 %v679_v6  ;;  %v38_v16 = vld [vmem:[%s925_s1 + $0x20] sm:$0x7]  ;;  %vm50_vm1 = vcmask 1042432   ;;  %vm46_vm2 = vcmask 285696   ;;  %592 = vmatpush3.bf16.msra.mxu1 %v591_v13  ;;  %v594_v18 = vpack.c.bf16 %v130_v15, %v129_v14 }
   0xa   :  { %v33_v17 = vld [vmem:[%s924_s0] sm:$0xff]  ;;  %593 = vmatprep.subr.bf16.mxu1 %v677_v3  ;;  %v131_v19 = vld [vmem:[%s927_s3 + $0x30] sm:$0xff]  ;;  %v132_v20 = vld [vmem:[%s927_s3 + $0x38] sm:$0xff]  ;;  %vm328_vm3 = vcmask 523264   ;;  %vm407_vm5 = vcmask 64512  }
   0xb   :  { %v597_v21 = vpack.c.bf16 %v132_v20, %v131_v19  ;;  %v133_v22 = vld [vmem:[%s927_s3 + $0x40] sm:$0xff]  ;;  %v134_v23 = vld [vmem:[%s927_s3 + $0x48] sm:$0xff]  ;;  %v135_v25 = vld [vmem:[%s927_s3 + $0x50] sm:$0xff] }
   0xc   :  { %488 = vmatpush3.msk.msra.mxu0 %vm50_vm1, %v38_v16  ;;  %v600_v24 = vpack.c.bf16 %v134_v23, %v133_v22  ;;  %v136_v26 = vld [vmem:[%s927_s3 + $0x58] sm:$0xff]  ;;  %v137_v28 = vld [vmem:[%s927_s3 + $0x60] sm:$0xff]  ;;  %v138_v29 = vld [vmem:[%s927_s3 + $0x68] sm:$0xff] }
   0xd   :  { %490 = vmatmul.mubr.msk.f32.vlgmr.msra.gmra.mrb[0].mxu0 %vm46_vm2, %v33_v17  ;;  %611 = vmatprep.subr.bf16.mxu0 %v677_v3  ;;  %v603_v27 = vpack.c.bf16 %v136_v26, %v135_v25  ;;  %v606_v30 = vpack.c.bf16 %v138_v29, %v137_v28  ;;  %v139_v31 = vld [vmem:[%s927_s3 + $0x70] sm:$0xff]  ;;  %v140_v32 = vld [vmem:[%s927_s3 + $0x78] sm:$0xff]  ;;  %v219_v34 = vld [vmem:[%s929_s5] sm:$0xff]  ;;  %v402_v25 = vlaneseq }
   0xe   :  { %595 = vmatpush3.bf16.msra.mxu1 %v594_v18  ;;  %559 = vmatprep.mubr.msk.f32.mxu0 %vm678_vm0, %v679_v6  ;;  %v609_v33 = vpack.c.bf16 %v140_v32, %v139_v31  ;;  %v220_v35 = vld [vmem:[%s929_s5 + $0x8] sm:$0xff]  ;;  %v221_v36 = vld [vmem:[%s929_s5 + $0x10] sm:$0xff]  ;;  %v222_v38 = vld [vmem:[%s929_s5 + $0x18] sm:$0xff] }
   0xf   :  { %596 = vmatprep.subr.bf16.mxu1 %v677_v3  ;;  %v612_v37 = vpack.c.bf16 %v220_v35, %v219_v34  ;;  %v615_v39 = vpack.c.bf16 %v222_v38, %v221_v36  ;;  %v223_v40 = vld [vmem:[%s929_s5 + $0x20] sm:$0xff]  ;;  %v224_v41 = vld [vmem:[%s929_s5 + $0x28] sm:$0xff]  ;;  %v225_v43 = vld [vmem:[%s929_s5 + $0x30] sm:$0xff]  ;;  %v403_v26 = vand.u32 127, %v402_v25 }
  0x10   :  { %v618_v42 = vpack.c.bf16 %v224_v41, %v223_v40  ;;  %v226_v44 = vld [vmem:[%s929_s5 + $0x38] sm:$0xff]  ;;  %v227_v46 = vld [vmem:[%s929_s5 + $0x40] sm:$0xff]  ;;  %v228_v47 = vld [vmem:[%s929_s5 + $0x48] sm:$0xff] }
  0x11   :  { %613 = vmatpush3.bf16.msra.mxu0 %v612_v37  ;;  %v621_v45 = vpack.c.bf16 %v226_v44, %v225_v43  ;;  %v624_v48 = vpack.c.bf16 %v228_v47, %v227_v46  ;;  %v229_v49 = vld [vmem:[%s929_s5 + $0x50] sm:$0xff]  ;;  %v230_v50 = vld [vmem:[%s929_s5 + $0x58] sm:$0xff]  ;;  %v231_v52 = vld [vmem:[%s929_s5 + $0x60] sm:$0xff]  ;;  %vm404_vm4 = vcmp.eq.s32.totalorder %v403_v26, 0 }
  0x12   :  { %598 = vmatpush3.bf16.msra.mxu1 %v597_v21  ;;  %614 = vmatprep.subr.bf16.mxu0 %v677_v3  ;;  %v627_v51 = vpack.c.bf16 %v230_v50, %v229_v49  ;;  %v232_v53 = vld [vmem:[%s929_s5 + $0x68] sm:$0xff]  ;;  %v423_v55 = vld [vmem:[%s926_s2] ss:$0 sm:$0xff]  ;;  %v233_v60 = vld [vmem:[%s929_s5 + $0x70] sm:$0xff] }
  0x13   :  { %599 = vmatprep.subr.bf16.mxu1 %v677_v3  ;;  %v630_v54 = vpack.c.bf16 %v232_v53, %v231_v52  ;;  %v234_v61 = vld [vmem:[%s929_s5 + $0x78] sm:$0xff]  ;;  %v313_v63 = vld [vmem:[%s931_s7] sm:$0xff]  ;;  %v314_v0 = vld [vmem:[%s931_s7 + $0x8] sm:$0xff] }
  0x14   :  { %v633_v62 = vpack.c.bf16 %v234_v61, %v233_v60  ;;  %v315_v1 = vld [vmem:[%s931_s7 + $0x10] sm:$0xff]  ;;  %v636_v2 = vpack.c.bf16 %v314_v0, %v313_v63  ;;  %v316_v4 = vld [vmem:[%s931_s7 + $0x18] sm:$0xff]  ;;  %v318_v7 = vld [vmem:[%s931_s7 + $0x28] sm:$0xff] }
  0x15   :  { %616 = vmatpush3.bf16.msra.mxu0 %v615_v39  ;;  %v639_v5 = vpack.c.bf16 %v316_v4, %v315_v1  ;;  %v426_v9 = vld [vmem:[%s928_s4] ss:$0 sm:$0xff]  ;;  %v319_v14 = vld [vmem:[%s931_s7 + $0x30] sm:$0xff]  ;;  %v320_v15 = vld [vmem:[%s931_s7 + $0x38] sm:$0xff] }
  0x16   :  { %601 = vmatpush3.bf16.msra.mxu1 %v600_v24  ;;  %617 = vmatprep.subr.bf16.mxu0 %v677_v3  ;;  %v645_v16 = vpack.c.bf16 %v320_v15, %v319_v14  ;;  %v428_v21 = vld [vmem:[%s932_s8] ss:$0 sm:$0xff] }
  0x17   :  { %602 = vmatprep.subr.bf16.mxu1 %v677_v3 }
  0x19   :  { %619 = vmatpush3.bf16.msra.mxu0 %v618_v42 }
  0x1a   :  { %604 = vmatpush3.bf16.msra.mxu1 %v603_v27  ;;  %620 = vmatprep.subr.bf16.mxu0 %v677_v3 }
  0x1b   :  { %605 = vmatprep.subr.bf16.mxu1 %v677_v3 }
  0x1d   :  { %622 = vmatpush3.bf16.msra.mxu0 %v621_v45 }
  0x1e   :  { %607 = vmatpush3.bf16.msra.mxu1 %v606_v30  ;;  %623 = vmatprep.subr.bf16.mxu0 %v677_v3 }
  0x1f   :  { %608 = vmatprep.subr.bf16.mxu1 %v677_v3 }
  0x21   :  { %625 = vmatpush3.bf16.msra.mxu0 %v624_v48 }
  0x22   :  { %610 = vmatpush3.bf16.msra.mxu1 %v609_v33  ;;  %626 = vmatprep.subr.bf16.mxu0 %v677_v3 }
  0x23   :  { %635 = vmatprep.subr.bf16.mxu1 %v677_v3 }
  0x25   :  { %628 = vmatpush3.bf16.msra.mxu0 %v627_v51 }
  0x26   :  { %629 = vmatprep.subr.bf16.mxu0 %v677_v3 }
  0x29   :  { %631 = vmatpush3.bf16.msra.mxu0 %v630_v54 }
  0x2a   :  { %632 = vmatprep.subr.bf16.mxu0 %v677_v3 }
  0x2d   :  { %634 = vmatpush3.bf16.msra.mxu0 %v633_v62 }
  0xe0   :  { %v120_v56 = vpop.f32.mrb[0].mxu0 }
  0xe1   :  { %v121_v57 = vadd.f32 %v423_v55, %v120_v56  ;;  %v491_v58 = vpop.f32.mrb[1].mxu0 }
  0xe3   :  { %v124_v59 = vmax.f32 %v121_v57, 0.0 }
  0xe5   :  { %525 = vmatmul.mubr.f32.vlgmr.msra.gmra.mrb[0].mxu1 %v124_v59 }
  0xe6   :  { %578 = vmatprep.mubr.msk.f32.mxu1 %vm678_vm0, %v679_v6  ;;  %637 = vmatpush3.bf16.msra.mxu1 %v636_v2  ;;  %v317_v6 = vld [vmem:[%s931_s7 + $0x20] sm:$0xff]  ;;  %s680_s7 = smov [#allocation2]  }
  0xe7   :  { %638 = vmatprep.subr.bf16.mxu1 %v677_v3  ;;  %v642_v8 = vpack.c.bf16 %v318_v7, %v317_v6  ;;  %s415_s14 = sshll.u32 %s680_s7, 4  ;;  %s416_s14 = int_to_ptr.vmem [resolvable:$true] %s415_s14 }
  0xe8   :  { %p658_p1 = scmp.lt.s32.totalorder %s416_s14, %s416_s14 }
  0xea   :  { %640 = vmatpush3.bf16.msra.mxu1 %v639_v5 }
  0xeb   :  { %641 = vmatprep.subr.bf16.mxu1 %v677_v3 }
  0xee   :  { %643 = vmatpush3.bf16.msra.mxu1 %v642_v8 }
  0xef   :  { %644 = vmatprep.subr.bf16.mxu1 %v677_v3  ;;  %v427_v3 = vld [vmem:[%s930_s6] ss:$0 sm:$0xff]  ;;  %s653_s6 = scalar_lea.vmem %s416_s14, 128 }
  0xf0   :  { %p654_p0 = scmp.ne.s32.totalorder %s416_s14, %s653_s6  ;;  %p659_p2 = scmp.lt.s32.totalorder %s653_s6, %s653_s6 }
  0xf2   :  { %646 = vmatpush3.bf16.msra.mxu1 %v645_v16  ;;  %p660_p3 = por %p659_p2, %p658_p1 }
  0xf4   :  { %p661_p4 = pnand %p660_p3, %p654_p0 }
 0x1b8   :  { %v214_v10 = vpop.f32.mrb[0].mxu1 }
 0x1b9   :  { %v215_v11 = vadd.f32 %v426_v9, %v214_v10  ;;  %v526_v12 = vpop.f32.mrb[1].mxu1 }
 0x1bb   :  { %v218_v13 = vmax.f32 %v215_v11, 0.0 }
 0x1bd   :  { %560 = vmatmul.mubr.f32.vlgmr.msra.gmra.mrb[2].mxu0 %v218_v13 }
 0x290   :  { %v308_v17 = vpop.f32.mrb[2].mxu0 }
 0x291   :  { %v309_v18 = vadd.f32 %v427_v3, %v308_v17  ;;  %v561_v19 = vpop.f32.mrb[3].mxu0 }
 0x293   :  { %v312_v20 = vmax.f32 %v309_v18, 0.0 }
 0x295   :  { %579 = vmatmul.mubr.msk.f32.vlgmr.msra.gmra.mrb[2].mxu1 %vm328_vm3, %v312_v20 }
 0x368   :  { %v398_v22 = vpop.f32.mrb[2].mxu1 }
 0x369   :  { %v399_v23 = vadd.f32 %v428_v21, %v398_v22  ;;  %v580_v24 = vpop.f32.mrb[3].mxu1 }
 0x36b   :  { %651 = vtanh.f32 %v399_v23 }
 0x375   :  { %v652_v27 = vpop.eup %651 }
 0x376   :  { %v406_v28 = vsel %vm404_vm4, %v652_v27, %v399_v23 }
 0x377   :  { %408 = vst.msk [vmem:[#allocation2] sm:$0xff] %vm407_vm5, %v406_v28 }
 0x378   :  { %664 = shalt.err (!%p661_p4)
}
 0x379   :  { %s665_s0 = scalar_lea.hbm %s933_s9, 128 }
 0x37a   :  { %p666_p5 = scmp.ne.s32.totalorder %s933_s9, %s665_s0  ;;  %p669_p6 = scmp.lt.u32.totalorder %s665_s0, %s933_s9 }
 0x37c   :  { %p671_p7 = pnand %p669_p6, %p666_p5 }
 0x37e   :  { %674 = shalt.err (!%p671_p7)
}
 0x37f   :  { %418 = dma.vmem_to_hbm [thread:$0]  %s416_s14, 128, %s933_s9, [#allocation3]  }
 0x380   :  { %675 = dma.done.wait [#allocation3], 128  }
 0x381   :  { %676 = vsyncadd [#allocation3], 4294967168 }
 0x382   :  { %422 = vsyncpa [#allocation3], 1 }

</bundles_post_ra>
